<compile_context>
chip_gen: v6e
topology: v6e:2x2x1
jax: 0.10.0
libtpu: 0.0.40
codegen_flags: <defaults>
</compile_context>

<pallas_src>
import functools
import math

import jax
import jax.numpy as jnp
from jax.experimental import pallas as pl
from jax.experimental.pallas import tpu as pltpu


def encoder_layer_kernel(x_ref, bias_ref,
                         wqkv_ref, wo_ref, w1_ref, w2_ref,
                         g1_ref, b1_ref, g2_ref, b2_ref,
                         out_ref, attn_ref,
                         *, heads, eps=1e-5):
    bb, S, _ = bias_ref.shape            # batches in this block, seq len
    rows, D = x_ref.shape                # rows == bb * S
    H = heads
    dk = D // H
    G = bb * H                           # stacked (batch, head) axis

    x2d = x_ref[...]                                     # [rows, D] f32
    x_bf = x2d.astype(jnp.bfloat16)

    # ---- Fused QKV projection: one MXU matmul with N = 3D ----
    qkv = jnp.dot(x_bf, wqkv_ref[...],
                  preferred_element_type=jnp.float32)    # [rows, 3D] f32

    # ---- Head split as pure value ops (no VMEM scratch, no masked stores).
    # Static slices + one stack along a leading (non-lane) axis; cast to bf16
    # up front so the relayout moves half the bytes and the einsums get
    # MXU-friendly operands directly.
    def split_heads(col0):
        parts = []
        for b in range(bb):
            blk = qkv[b * S:(b + 1) * S, col0:col0 + D].astype(jnp.bfloat16)
            for h in range(H):
                parts.append(blk[:, h * dk:(h + 1) * dk])      # [S, dk]
        return jnp.stack(parts, axis=0)                        # [G, S, dk]

    q_st = split_heads(0)
    k_st = split_heads(D)
    v_st = split_heads(2 * D)

    # ---- Scaled dot-product attention, batched over (batch * head) ----
    # (1/sqrt(dk) is already folded into the Q columns of wqkv.)
    scores = jnp.einsum('gqd,gkd->gqk', q_st, k_st,
                        preferred_element_type=jnp.float32)     # [G, S, S]
    scores = scores.reshape(bb, H, S, S)
    # Additive mask bias (precomputed bf16 in the wrapper): one vadd per
    # element instead of compare+select over the [bb, H, S, S] tensor.
    scores = scores + bias_ref[...].astype(jnp.float32)[:, None, :, :]

    m = jnp.max(scores, axis=-1, keepdims=True)
    e = jnp.exp(scores - m)
    denom = jnp.sum(e, axis=-1, keepdims=True)
    probs = e * pl.reciprocal(denom, approx=True)               # [bb, H, S, S]
    attn_ref[...] = probs.astype(attn_ref.dtype)                # one block store

    ctx = jnp.einsum('gqk,gkd->gqd',
                     probs.reshape(G, S, S).astype(jnp.bfloat16), v_st,
                     preferred_element_type=jnp.float32)        # [G, S, dk]
    ctx = ctx.astype(jnp.bfloat16)

    # Merge heads back to [rows, D] as value concatenates (no ctx scratch).
    per_batch = [jnp.concatenate([ctx[b * H + h] for h in range(H)], axis=-1)
                 for b in range(bb)]                            # bb x [S, D]
    ctx2d = per_batch[0] if bb == 1 else jnp.concatenate(per_batch, axis=0)

    # ---- Output projection + residual ----
    attn_out = jnp.dot(ctx2d, wo_ref[...],
                       preferred_element_type=jnp.float32) + x2d

    # ---- LayerNorm 1 (f32 elementwise) ----
    mu = jnp.mean(attn_out, axis=-1, keepdims=True)
    var = jnp.mean((attn_out - mu) ** 2, axis=-1, keepdims=True)
    ln1 = (attn_out - mu) * jax.lax.rsqrt(var + eps) * g1_ref[...] + b1_ref[...]

    # ---- Position-wise FFN + residual ----
    h1 = jnp.maximum(
        jnp.dot(ln1.astype(jnp.bfloat16), w1_ref[...],
                preferred_element_type=jnp.float32), 0.0)
    ffn = jnp.dot(h1.astype(jnp.bfloat16), w2_ref[...],
                  preferred_element_type=jnp.float32) + ln1

    # ---- LayerNorm 2 ----
    mu2 = jnp.mean(ffn, axis=-1, keepdims=True)
    var2 = jnp.mean((ffn - mu2) ** 2, axis=-1, keepdims=True)
    ln2 = (ffn - mu2) * jax.lax.rsqrt(var2 + eps) * g2_ref[...] + b2_ref[...]

    out_ref[...] = ln2.astype(out_ref.dtype)


def prepare_params(params, heads):
    """One-time weight re-packing (outside the per-call jit path):
    fuse W_Q/W_K/W_V into a single [D, 3D] matrix with the 1/sqrt(dk) scale
    folded into the Q columns, and cast matmul weights to bf16 for the MXU."""
    D = params["wq"].shape[0]
    dk = D // heads
    scale = 1.0 / math.sqrt(dk)
    wqkv = jnp.concatenate(
        [params["wq"] * scale, params["wk"], params["wv"]], axis=1)
    return {
        "wqkv": wqkv.astype(jnp.bfloat16),
        "wo": params["wo"].astype(jnp.bfloat16),
        "w1": params["w1"].astype(jnp.bfloat16),
        "w2": params["w2"].astype(jnp.bfloat16),
        "g1": params["g1"], "b1": params["b1"],
        "g2": params["g2"], "b2": params["b2"],
    }


def _vmem_limit_bytes(bb, S, D, FF, H):
    """Estimate the per-step VMEM footprint (double-buffered blocks, resident
    weights, live intermediates) with headroom, clamped to the 64 MiB v7x
    budget and never below the 32 MiB scoped default."""
    f32b, bf16b = 4, 2
    rows, dk, G = bb * S, D // H, bb * H
    block_bytes = 2 * (2 * rows * D * f32b          # x block + out block
                       + bb * S * S * bf16b         # bias block
                       + bb * H * S * S * f32b)     # attn block
    weight_bytes = 2 * ((3 * D * D + D * D + D * FF + FF * D) * bf16b
                        + 4 * D * f32b)             # double-buffered weights
    live_bytes = (rows * 3 * D * f32b               # qkv
                  + 3 * G * S * dk * bf16b          # q/k/v stacks
                  + 3 * G * S * S * f32b            # scores / e / probs
                  + G * S * dk * f32b               # ctx
                  + 3 * rows * D * f32b             # attn_out / ln1 / ffn
                  + rows * FF * f32b)               # h1
    est = 2 * (block_bytes + weight_bytes + live_bytes)
    return int(min(64 * 1024 * 1024, max(32 * 1024 * 1024, est)))


def encoder_layer(x, mask, kparams, heads, *, batch_block=None):
    B, S, D = x.shape
    FF = kparams["w1"].shape[1]
    H = heads
    if batch_block is None:
        # Default to >= 2 grid steps so the pipeline overlaps DMA with compute
        # and the "parallel" axis can shard across v7x's two TensorCores.
        bb = B // 2 if B % 2 == 0 else B
    else:
        bb = batch_block
    assert B % bb == 0, "batch_block must divide batch"
    nblocks = B // bb
    rows = bb * S

    # Lane-dense activation slab [B*S, D]; wrapper reshapes are layout plumbing.
    x2d = x.reshape(B * S, D)
    # Additive mask bias stored bf16: halves the per-step mask DMA bytes and
    # replaces cmp+select with an add inside the kernel.
    bias = (mask * jnp.float32(-1e9)).astype(jnp.bfloat16)

    def full(shape):
        n = len(shape)
        return pl.BlockSpec(shape, lambda i, _n=n: (0,) * _n)

    kernel = functools.partial(encoder_layer_kernel, heads=H)
    out2d, attn = pl.pallas_call(
        kernel,
        out_shape=(
            jax.ShapeDtypeStruct((B * S, D), jnp.float32),    # enc_outputs (flat)
            jax.ShapeDtypeStruct((B, H, S, S), jnp.float32),  # attention probs
        ),
        grid=(nblocks,),
        in_specs=[
            pl.BlockSpec((rows, D), lambda i: (i, 0)),
            pl.BlockSpec((bb, S, S), lambda i: (i, 0, 0)),
            full((D, 3 * D)), full((D, D)),
            full((D, FF)), full((FF, D)),
            full((1, D)), full((1, D)), full((1, D)), full((1, D)),
        ],
        out_specs=[
            pl.BlockSpec((rows, D), lambda i: (i, 0)),
            pl.BlockSpec((bb, H, S, S), lambda i: (i, 0, 0, 0)),
        ],
        compiler_params=pltpu.CompilerParams(
            dimension_semantics=("parallel",),
            vmem_limit_bytes=_vmem_limit_bytes(bb, S, D, FF, H)),
    )(x2d, bias,
      kparams["wqkv"], kparams["wo"], kparams["w1"], kparams["w2"],
      kparams["g1"], kparams["b1"], kparams["g2"], kparams["b2"])
    return out2d.reshape(B, S, D), attn


def _reference(x, mask, params, heads, eps=1e-5):
    """Pure-JAX (f32) reference mirroring the PyTorch forward pass."""
    B, S, D = x.shape
    dk = D // heads
    q = (x @ params["wq"]).reshape(B, S, heads, dk).transpose(0, 2, 1, 3)
    k = (x @ params["wk"]).reshape(B, S, heads, dk).transpose(0, 2, 1, 3)
    v = (x @ params["wv"]).reshape(B, S, heads, dk).transpose(0, 2, 1, 3)
    scores = jnp.einsum("bhqd,bhkd->bhqk", q, k) / math.sqrt(dk)
    scores = jnp.where(mask[:, None] > 0.0, -1e9, scores)
    attn = jax.nn.softmax(scores, axis=-1)
    ctx = jnp.einsum("bhqk,bhkd->bhqd", attn, v).transpose(0, 2, 1, 3).reshape(B, S, D)
    ao = ctx @ params["wo"] + x
    ln1 = (ao - ao.mean(-1, keepdims=True)) * jax.lax.rsqrt(
        ao.var(-1, keepdims=True) + eps) * params["g1"][0] + params["b1"][0]
    ffn = jnp.maximum(ln1 @ params["w1"], 0.0) @ params["w2"] + ln1
    ln2 = (ffn - ffn.mean(-1, keepdims=True)) * jax.lax.rsqrt(
        ffn.var(-1, keepdims=True) + eps) * params["g2"][0] + params["b2"][0]
    return ln2, attn


if __name__ == "__main__":
    B, S, D, H, FF = 2, 8, 32, 4, 64

    key = jax.random.PRNGKey(0)
    keys = jax.random.split(key, 8)
    scale = 0.1
    params = {
        "wq": jax.random.normal(keys[0], (D, D), jnp.float32) * scale,
        "wk": jax.random.normal(keys[1], (D, D), jnp.float32) * scale,
        "wv": jax.random.normal(keys[2], (D, D), jnp.float32) * scale,
        "wo": jax.random.normal(keys[3], (D, D), jnp.float32) * scale,
        "w1": jax.random.normal(keys[4], (D, FF), jnp.float32) * scale,
        "w2": jax.random.normal(keys[5], (FF, D), jnp.float32) * scale,
        # nn.LayerNorm defaults: weight=1, bias=0
        "g1": jnp.ones((1, D), jnp.float32),
        "b1": jnp.zeros((1, D), jnp.float32),
        "g2": jnp.ones((1, D), jnp.float32),
        "b2": jnp.zeros((1, D), jnp.float32),
    }
    kparams = prepare_params(params, H)   # one-time, outside the jit path

    x = jax.random.normal(keys[6], (B, S, D), jnp.float32)
    # padding-style mask: last 2 keys of each sequence are masked out
    mask = jnp.zeros((B, S, S), jnp.float32).at[:, :, -2:].set(1.0)

    enc_out, attn = jax.jit(
        lambda xx, mm: encoder_layer(xx, mm, kparams, H))(x, mask)
    jax.block_until_ready((enc_out, attn))

    ref_out, ref_attn = _reference(x, mask, params, H)
    assert enc_out.shape == (B, S, D) and attn.shape == (B, H, S, S)
    # bf16 matmul operands (f32 accumulation) + approx reciprocal -> slightly
    # looser tolerance than a pure-f32 kernel.
    assert jnp.allclose(enc_out, ref_out, atol=2e-2, rtol=2e-2), (
        float(jnp.max(jnp.abs(enc_out - ref_out))))
    assert jnp.allclose(attn, ref_attn, atol=1e-2, rtol=1e-2), (
        float(jnp.max(jnp.abs(attn - ref_attn))))

    print("KERNEL_OK")
</pallas_src>

<mosaic_0001>
module attributes {stable_mosaic.version = 11 : i64} {
  func.func @encoder_layer_kernel(%arg0: i32, %arg1: memref<8x32xf32, #tpu.memory_space<vmem>>, %arg2: memref<1x8x8xbf16, #tpu.memory_space<vmem>>, %arg3: memref<32x96xbf16, #tpu.memory_space<vmem>>, %arg4: memref<32x32xbf16, #tpu.memory_space<vmem>>, %arg5: memref<32x64xbf16, #tpu.memory_space<vmem>>, %arg6: memref<64x32xbf16, #tpu.memory_space<vmem>>, %arg7: memref<1x32xf32, #tpu.memory_space<vmem>>, %arg8: memref<1x32xf32, #tpu.memory_space<vmem>>, %arg9: memref<1x32xf32, #tpu.memory_space<vmem>>, %arg10: memref<1x32xf32, #tpu.memory_space<vmem>>, %arg11: memref<8x32xf32, #tpu.memory_space<vmem>>, %arg12: memref<1x4x8x8xf32, #tpu.memory_space<vmem>>) attributes {dimension_semantics = [#tpu.dimension_semantics<parallel>], iteration_bounds = array<i64: 2>, scalar_prefetch = 0 : i64, scratch_operands = 0 : i64, tpu.core_type = #tpu.core_type<tc>, window_params = [{transform_indices = @transform_0, window_bounds = array<i64: 8, 32>}, {transform_indices = @transform_1, window_bounds = array<i64: 1, 8, 8>}, {pipeline_mode = #tpu.pipeline_mode<synchronous>, transform_indices = @transform_2, window_bounds = array<i64: 32, 96>}, {pipeline_mode = #tpu.pipeline_mode<synchronous>, transform_indices = @transform_3, window_bounds = array<i64: 32, 32>}, {pipeline_mode = #tpu.pipeline_mode<synchronous>, transform_indices = @transform_4, window_bounds = array<i64: 32, 64>}, {pipeline_mode = #tpu.pipeline_mode<synchronous>, transform_indices = @transform_5, window_bounds = array<i64: 64, 32>}, {pipeline_mode = #tpu.pipeline_mode<synchronous>, transform_indices = @transform_6, window_bounds = array<i64: 1, 32>}, {pipeline_mode = #tpu.pipeline_mode<synchronous>, transform_indices = @transform_7, window_bounds = array<i64: 1, 32>}, {pipeline_mode = #tpu.pipeline_mode<synchronous>, transform_indices = @transform_8, window_bounds = array<i64: 1, 32>}, {pipeline_mode = #tpu.pipeline_mode<synchronous>, transform_indices = @transform_9, window_bounds = array<i64: 1, 32>}, {transform_indices = @transform_10, window_bounds = array<i64: 8, 32>}, {transform_indices = @transform_11, window_bounds = array<i64: 1, 4, 8, 8>}]} {
    %c0 = arith.constant 0 : index
    %c0_0 = arith.constant 0 : index
    %0 = vector.load %arg1[%c0, %c0_0] : memref<8x32xf32, #tpu.memory_space<vmem>>, vector<8x32xf32>
    %1 = arith.truncf %0 : vector<8x32xf32> to vector<8x32xbf16>
    %c0_1 = arith.constant 0 : index
    %c0_2 = arith.constant 0 : index
    %2 = vector.load %arg3[%c0_1, %c0_2] : memref<32x96xbf16, #tpu.memory_space<vmem>>, vector<32x96xbf16>
    %cst = arith.constant dense<0.000000e+00> : vector<8x96xf32>
    %3 = tpu.matmul %1, %2, %cst {dimension_numbers = #tpu.dot_dimension_numbers<[1], [0], [0], [1], [0, 0, 1, 1], [], []>} : vector<8x32xbf16>, vector<32x96xbf16>, vector<8x96xf32> -> vector<8x96xf32>
    %4 = vector.extract_strided_slice %3 {offsets = [0, 0], sizes = [8, 32], strides = [1, 1]} : vector<8x96xf32> to vector<8x32xf32>
    %5 = arith.truncf %4 : vector<8x32xf32> to vector<8x32xbf16>
    %6 = vector.extract_strided_slice %5 {offsets = [0, 0], sizes = [8, 8], strides = [1, 1]} : vector<8x32xbf16> to vector<8x8xbf16>
    %7 = vector.extract_strided_slice %5 {offsets = [0, 8], sizes = [8, 8], strides = [1, 1]} : vector<8x32xbf16> to vector<8x8xbf16>
    %8 = vector.extract_strided_slice %5 {offsets = [0, 16], sizes = [8, 8], strides = [1, 1]} : vector<8x32xbf16> to vector<8x8xbf16>
    %9 = vector.extract_strided_slice %5 {offsets = [0, 24], sizes = [8, 8], strides = [1, 1]} : vector<8x32xbf16> to vector<8x8xbf16>
    %10 = vector.shape_cast %6 : vector<8x8xbf16> to vector<1x8x8xbf16>
    %11 = vector.shape_cast %7 : vector<8x8xbf16> to vector<1x8x8xbf16>
    %12 = vector.shape_cast %8 : vector<8x8xbf16> to vector<1x8x8xbf16>
    %13 = vector.shape_cast %9 : vector<8x8xbf16> to vector<1x8x8xbf16>
    %14 = tpu.concatenate %10, %11, %12, %13 in 0 : vector<1x8x8xbf16>, vector<1x8x8xbf16>, vector<1x8x8xbf16>, vector<1x8x8xbf16> -> vector<4x8x8xbf16>
    %15 = vector.extract_strided_slice %3 {offsets = [0, 32], sizes = [8, 32], strides = [1, 1]} : vector<8x96xf32> to vector<8x32xf32>
    %16 = arith.truncf %15 : vector<8x32xf32> to vector<8x32xbf16>
    %17 = vector.extract_strided_slice %16 {offsets = [0, 0], sizes = [8, 8], strides = [1, 1]} : vector<8x32xbf16> to vector<8x8xbf16>
    %18 = vector.extract_strided_slice %16 {offsets = [0, 8], sizes = [8, 8], strides = [1, 1]} : vector<8x32xbf16> to vector<8x8xbf16>
    %19 = vector.extract_strided_slice %16 {offsets = [0, 16], sizes = [8, 8], strides = [1, 1]} : vector<8x32xbf16> to vector<8x8xbf16>
    %20 = vector.extract_strided_slice %16 {offsets = [0, 24], sizes = [8, 8], strides = [1, 1]} : vector<8x32xbf16> to vector<8x8xbf16>
    %21 = vector.shape_cast %17 : vector<8x8xbf16> to vector<1x8x8xbf16>
    %22 = vector.shape_cast %18 : vector<8x8xbf16> to vector<1x8x8xbf16>
    %23 = vector.shape_cast %19 : vector<8x8xbf16> to vector<1x8x8xbf16>
    %24 = vector.shape_cast %20 : vector<8x8xbf16> to vector<1x8x8xbf16>
    %25 = tpu.concatenate %21, %22, %23, %24 in 0 : vector<1x8x8xbf16>, vector<1x8x8xbf16>, vector<1x8x8xbf16>, vector<1x8x8xbf16> -> vector<4x8x8xbf16>
    %26 = vector.extract_strided_slice %3 {offsets = [0, 64], sizes = [8, 32], strides = [1, 1]} : vector<8x96xf32> to vector<8x32xf32>
    %27 = arith.truncf %26 : vector<8x32xf32> to vector<8x32xbf16>
    %28 = vector.extract_strided_slice %27 {offsets = [0, 0], sizes = [8, 8], strides = [1, 1]} : vector<8x32xbf16> to vector<8x8xbf16>
    %29 = vector.extract_strided_slice %27 {offsets = [0, 8], sizes = [8, 8], strides = [1, 1]} : vector<8x32xbf16> to vector<8x8xbf16>
    %30 = vector.extract_strided_slice %27 {offsets = [0, 16], sizes = [8, 8], strides = [1, 1]} : vector<8x32xbf16> to vector<8x8xbf16>
    %31 = vector.extract_strided_slice %27 {offsets = [0, 24], sizes = [8, 8], strides = [1, 1]} : vector<8x32xbf16> to vector<8x8xbf16>
    %32 = vector.shape_cast %28 : vector<8x8xbf16> to vector<1x8x8xbf16>
    %33 = vector.shape_cast %29 : vector<8x8xbf16> to vector<1x8x8xbf16>
    %34 = vector.shape_cast %30 : vector<8x8xbf16> to vector<1x8x8xbf16>
    %35 = vector.shape_cast %31 : vector<8x8xbf16> to vector<1x8x8xbf16>
    %36 = tpu.concatenate %32, %33, %34, %35 in 0 : vector<1x8x8xbf16>, vector<1x8x8xbf16>, vector<1x8x8xbf16>, vector<1x8x8xbf16> -> vector<4x8x8xbf16>
    "tpu.trace_start"() <{level = 10 : i32, message = "gqd,gkd->gqk"}> : () -> ()
    %cst_3 = arith.constant dense<0.000000e+00> : vector<4x8x8xf32>
    %37 = tpu.matmul %14, %25, %cst_3 {dimension_numbers = #tpu.dot_dimension_numbers<[2], [2], [1], [1], [0, 0, 0, 1, 1, 1], [0], [0]>} : vector<4x8x8xbf16>, vector<4x8x8xbf16>, vector<4x8x8xf32> -> vector<4x8x8xf32>
    "tpu.trace_stop"() : () -> ()
    %38 = vector.shape_cast %37 : vector<4x8x8xf32> to vector<1x4x8x8xf32>
    %c0_4 = arith.constant 0 : index
    %c0_5 = arith.constant 0 : index
    %c0_6 = arith.constant 0 : index
    %39 = vector.load %arg2[%c0_4, %c0_5, %c0_6] : memref<1x8x8xbf16, #tpu.memory_space<vmem>>, vector<1x8x8xbf16>
    %40 = arith.extf %39 : vector<1x8x8xbf16> to vector<1x8x8xf32>
    %41 = vector.shape_cast %40 : vector<1x8x8xf32> to vector<1x1x8x8xf32>
    %42 = vector.broadcast %41 : vector<1x1x8x8xf32> to vector<1x4x8x8xf32>
    %43 = arith.addf %38, %42 : vector<1x4x8x8xf32>
    %cst_7 = arith.constant dense<0xFF800000> : vector<1x4x8xf32>
    %44 = vector.multi_reduction <maximumf>, %43, %cst_7 [3] : vector<1x4x8x8xf32> to vector<1x4x8xf32>
    %45 = vector.shape_cast %44 : vector<1x4x8xf32> to vector<1x4x8x1xf32>
    %46 = vector.broadcast %45 : vector<1x4x8x1xf32> to vector<1x4x8x8xf32>
    %47 = arith.subf %43, %46 : vector<1x4x8x8xf32>
    %48 = math.exp %47 : vector<1x4x8x8xf32>
    %cst_8 = arith.constant dense<0.000000e+00> : vector<1x4x8xf32>
    %49 = vector.multi_reduction <add>, %48, %cst_8 [3] : vector<1x4x8x8xf32> to vector<1x4x8xf32>
    %50 = vector.shape_cast %49 : vector<1x4x8xf32> to vector<1x4x8x1xf32>
    %51 = tpu.reciprocal %50 {approx = true} : vector<1x4x8x1xf32> -> vector<1x4x8x1xf32>
    %52 = vector.broadcast %51 : vector<1x4x8x1xf32> to vector<1x4x8x8xf32>
    %53 = arith.mulf %48, %52 : vector<1x4x8x8xf32>
    %c0_9 = arith.constant 0 : index
    %c0_10 = arith.constant 0 : index
    %c0_11 = arith.constant 0 : index
    %c0_12 = arith.constant 0 : index
    %54 = vector.load %arg12[%c0_9, %c0_10, %c0_11, %c0_12] : memref<1x4x8x8xf32, #tpu.memory_space<vmem>>, vector<1x4x8x8xf32>
    tpu.vector_store %arg12[%c0_9, %c0_10, %c0_11, %c0_12], %53 {strides = array<i32>} : memref<1x4x8x8xf32, #tpu.memory_space<vmem>>, vector<1x4x8x8xf32>,
    %55 = vector.shape_cast %53 : vector<1x4x8x8xf32> to vector<4x8x8xf32>
    %56 = arith.truncf %55 : vector<4x8x8xf32> to vector<4x8x8xbf16>
    "tpu.trace_start"() <{level = 10 : i32, message = "gqk,gkd->gqd"}> : () -> ()
    %cst_13 = arith.constant dense<0.000000e+00> : vector<4x8x8xf32>
    %57 = tpu.matmul %56, %36, %cst_13 {dimension_numbers = #tpu.dot_dimension_numbers<[2], [1], [1], [2], [0, 0, 0, 1, 1, 2], [0], [0]>} : vector<4x8x8xbf16>, vector<4x8x8xbf16>, vector<4x8x8xf32> -> vector<4x8x8xf32>
    "tpu.trace_stop"() : () -> ()
    %58 = arith.truncf %57 : vector<4x8x8xf32> to vector<4x8x8xbf16>
    %59 = vector.extract_strided_slice %58 {offsets = [0, 0, 0], sizes = [1, 8, 8], strides = [1, 1, 1]} : vector<4x8x8xbf16> to vector<1x8x8xbf16>
    %60 = vector.shape_cast %59 : vector<1x8x8xbf16> to vector<8x8xbf16>
    %61 = vector.extract_strided_slice %58 {offsets = [1, 0, 0], sizes = [1, 8, 8], strides = [1, 1, 1]} : vector<4x8x8xbf16> to vector<1x8x8xbf16>
    %62 = vector.shape_cast %61 : vector<1x8x8xbf16> to vector<8x8xbf16>
    %63 = vector.extract_strided_slice %58 {offsets = [2, 0, 0], sizes = [1, 8, 8], strides = [1, 1, 1]} : vector<4x8x8xbf16> to vector<1x8x8xbf16>
    %64 = vector.shape_cast %63 : vector<1x8x8xbf16> to vector<8x8xbf16>
    %65 = vector.extract_strided_slice %58 {offsets = [3, 0, 0], sizes = [1, 8, 8], strides = [1, 1, 1]} : vector<4x8x8xbf16> to vector<1x8x8xbf16>
    %66 = vector.shape_cast %65 : vector<1x8x8xbf16> to vector<8x8xbf16>
    %67 = tpu.concatenate %60, %62, %64, %66 in 1 : vector<8x8xbf16>, vector<8x8xbf16>, vector<8x8xbf16>, vector<8x8xbf16> -> vector<8x32xbf16>
    %c0_14 = arith.constant 0 : index
    %c0_15 = arith.constant 0 : index
    %68 = vector.load %arg4[%c0_14, %c0_15] : memref<32x32xbf16, #tpu.memory_space<vmem>>, vector<32x32xbf16>
    %cst_16 = arith.constant dense<0.000000e+00> : vector<8x32xf32>
    %69 = tpu.matmul %67, %68, %cst_16 {dimension_numbers = #tpu.dot_dimension_numbers<[1], [0], [0], [1], [0, 0, 1, 1], [], []>} : vector<8x32xbf16>, vector<32x32xbf16>, vector<8x32xf32> -> vector<8x32xf32>
    %70 = arith.addf %69, %0 : vector<8x32xf32>
    %cst_17 = arith.constant dense<0.000000e+00> : vector<8xf32>
    %71 = vector.multi_reduction <add>, %70, %cst_17 [1] : vector<8x32xf32> to vector<8xf32>
    %72 = vector.shape_cast %71 : vector<8xf32> to vector<8x1xf32>
    %cst_18 = arith.constant 3.200000e+01 : f32
    %73 = vector.broadcast %cst_18 : f32 to vector<8x1xf32>
    %74 = arith.divf %72, %73 : vector<8x1xf32>
    %75 = vector.broadcast %74 : vector<8x1xf32> to vector<8x32xf32>
    %76 = arith.subf %70, %75 : vector<8x32xf32>
    %77 = arith.mulf %76, %76 : vector<8x32xf32>
    %cst_19 = arith.constant dense<0.000000e+00> : vector<8xf32>
    %78 = vector.multi_reduction <add>, %77, %cst_19 [1] : vector<8x32xf32> to vector<8xf32>
    %79 = vector.shape_cast %78 : vector<8xf32> to vector<8x1xf32>
    %cst_20 = arith.constant 3.200000e+01 : f32
    %80 = vector.broadcast %cst_20 : f32 to vector<8x1xf32>
    %81 = arith.divf %79, %80 : vector<8x1xf32>
    %82 = vector.broadcast %74 : vector<8x1xf32> to vector<8x32xf32>
    %83 = arith.subf %70, %82 : vector<8x32xf32>
    %cst_21 = arith.constant 9.99999974E-6 : f32
    %84 = vector.broadcast %cst_21 : f32 to vector<8x1xf32>
    %85 = arith.addf %81, %84 : vector<8x1xf32>
    %86 = math.rsqrt %85 : vector<8x1xf32>
    %87 = vector.broadcast %86 : vector<8x1xf32> to vector<8x32xf32>
    %88 = arith.mulf %83, %87 : vector<8x32xf32>
    %c0_22 = arith.constant 0 : index
    %c0_23 = arith.constant 0 : index
    %89 = vector.load %arg7[%c0_22, %c0_23] : memref<1x32xf32, #tpu.memory_space<vmem>>, vector<1x32xf32>
    %90 = vector.broadcast %89 : vector<1x32xf32> to vector<8x32xf32>
    %91 = arith.mulf %88, %90 : vector<8x32xf32>
    %c0_24 = arith.constant 0 : index
    %c0_25 = arith.constant 0 : index
    %92 = vector.load %arg8[%c0_24, %c0_25] : memref<1x32xf32, #tpu.memory_space<vmem>>, vector<1x32xf32>
    %93 = vector.broadcast %92 : vector<1x32xf32> to vector<8x32xf32>
    %94 = arith.addf %91, %93 : vector<8x32xf32>
    %95 = arith.truncf %94 : vector<8x32xf32> to vector<8x32xbf16>
    %c0_26 = arith.constant 0 : index
    %c0_27 = arith.constant 0 : index
    %96 = vector.load %arg5[%c0_26, %c0_27] : memref<32x64xbf16, #tpu.memory_space<vmem>>, vector<32x64xbf16>
    %cst_28 = arith.constant dense<0.000000e+00> : vector<8x64xf32>
    %97 = tpu.matmul %95, %96, %cst_28 {dimension_numbers = #tpu.dot_dimension_numbers<[1], [0], [0], [1], [0, 0, 1, 1], [], []>} : vector<8x32xbf16>, vector<32x64xbf16>, vector<8x64xf32> -> vector<8x64xf32>
    %cst_29 = arith.constant 0.000000e+00 : f32
    %98 = vector.broadcast %cst_29 : f32 to vector<8x64xf32>
    %99 = arith.maximumf %97, %98 : vector<8x64xf32>
    %100 = arith.truncf %99 : vector<8x64xf32> to vector<8x64xbf16>
    %c0_30 = arith.constant 0 : index
    %c0_31 = arith.constant 0 : index
    %101 = vector.load %arg6[%c0_30, %c0_31] : memref<64x32xbf16, #tpu.memory_space<vmem>>, vector<64x32xbf16>
    %cst_32 = arith.constant dense<0.000000e+00> : vector<8x32xf32>
    %102 = tpu.matmul %100, %101, %cst_32 {dimension_numbers = #tpu.dot_dimension_numbers<[1], [0], [0], [1], [0, 0, 1, 1], [], []>} : vector<8x64xbf16>, vector<64x32xbf16>, vector<8x32xf32> -> vector<8x32xf32>
    %103 = arith.addf %102, %94 : vector<8x32xf32>
    %cst_33 = arith.constant dense<0.000000e+00> : vector<8xf32>
    %104 = vector.multi_reduction <add>, %103, %cst_33 [1] : vector<8x32xf32> to vector<8xf32>
    %105 = vector.shape_cast %104 : vector<8xf32> to vector<8x1xf32>
    %cst_34 = arith.constant 3.200000e+01 : f32
    %106 = vector.broadcast %cst_34 : f32 to vector<8x1xf32>
    %107 = arith.divf %105, %106 : vector<8x1xf32>
    %108 = vector.broadcast %107 : vector<8x1xf32> to vector<8x32xf32>
    %109 = arith.subf %103, %108 : vector<8x32xf32>
    %110 = arith.mulf %109, %109 : vector<8x32xf32>
    %cst_35 = arith.constant dense<0.000000e+00> : vector<8xf32>
    %111 = vector.multi_reduction <add>, %110, %cst_35 [1] : vector<8x32xf32> to vector<8xf32>
    %112 = vector.shape_cast %111 : vector<8xf32> to vector<8x1xf32>
    %cst_36 = arith.constant 3.200000e+01 : f32
    %113 = vector.broadcast %cst_36 : f32 to vector<8x1xf32>
    %114 = arith.divf %112, %113 : vector<8x1xf32>
    %115 = vector.broadcast %107 : vector<8x1xf32> to vector<8x32xf32>
    %116 = arith.subf %103, %115 : vector<8x32xf32>
    %cst_37 = arith.constant 9.99999974E-6 : f32
    %117 = vector.broadcast %cst_37 : f32 to vector<8x1xf32>
    %118 = arith.addf %114, %117 : vector<8x1xf32>
    %119 = math.rsqrt %118 : vector<8x1xf32>
    %120 = vector.broadcast %119 : vector<8x1xf32> to vector<8x32xf32>
    %121 = arith.mulf %116, %120 : vector<8x32xf32>
    %c0_38 = arith.constant 0 : index
    %c0_39 = arith.constant 0 : index
    %122 = vector.load %arg9[%c0_38, %c0_39] : memref<1x32xf32, #tpu.memory_space<vmem>>, vector<1x32xf32>
    %123 = vector.broadcast %122 : vector<1x32xf32> to vector<8x32xf32>
    %124 = arith.mulf %121, %123 : vector<8x32xf32>
    %c0_40 = arith.constant 0 : index
    %c0_41 = arith.constant 0 : index
    %125 = vector.load %arg10[%c0_40, %c0_41] : memref<1x32xf32, #tpu.memory_space<vmem>>, vector<1x32xf32>
    %126 = vector.broadcast %125 : vector<1x32xf32> to vector<8x32xf32>
    %127 = arith.addf %124, %126 : vector<8x32xf32>
    %c0_42 = arith.constant 0 : index
    %c0_43 = arith.constant 0 : index
    %128 = vector.load %arg11[%c0_42, %c0_43] : memref<8x32xf32, #tpu.memory_space<vmem>>, vector<8x32xf32>
    tpu.vector_store %arg11[%c0_42, %c0_43], %127 {strides = array<i32>} : memref<8x32xf32, #tpu.memory_space<vmem>>, vector<8x32xf32>,
    return
  }
  func.func @transform_0(%arg0: i32) -> (i32, i32) {
    %c0_i32 = arith.constant 0 : i32
    %c0_i32_0 = arith.constant 0 : i32
    return %arg0, %c0_i32 : i32, i32
  }
  func.func @transform_1(%arg0: i32) -> (i32, i32, i32) {
    %c0_i32 = arith.constant 0 : i32
    %c0_i32_0 = arith.constant 0 : i32
    %c0_i32_1 = arith.constant 0 : i32
    return %arg0, %c0_i32, %c0_i32_0 : i32, i32, i32
  }
  func.func @transform_2(%arg0: i32) -> (i32, i32) {
    %c0_i32 = arith.constant 0 : i32
    %c0_i32_0 = arith.constant 0 : i32
    %c0_i32_1 = arith.constant 0 : i32
    return %c0_i32, %c0_i32_0 : i32, i32
  }
  func.func @transform_3(%arg0: i32) -> (i32, i32) {
    %c0_i32 = arith.constant 0 : i32
    %c0_i32_0 = arith.constant 0 : i32
    %c0_i32_1 = arith.constant 0 : i32
    return %c0_i32, %c0_i32_0 : i32, i32
  }
  func.func @transform_4(%arg0: i32) -> (i32, i32) {
    %c0_i32 = arith.constant 0 : i32
    %c0_i32_0 = arith.constant 0 : i32
    %c0_i32_1 = arith.constant 0 : i32
    return %c0_i32, %c0_i32_0 : i32, i32
  }
  func.func @transform_5(%arg0: i32) -> (i32, i32) {
    %c0_i32 = arith.constant 0 : i32
    %c0_i32_0 = arith.constant 0 : i32
    %c0_i32_1 = arith.constant 0 : i32
    return %c0_i32, %c0_i32_0 : i32, i32
  }
  func.func @transform_6(%arg0: i32) -> (i32, i32) {
    %c0_i32 = arith.constant 0 : i32
    %c0_i32_0 = arith.constant 0 : i32
    %c0_i32_1 = arith.constant 0 : i32
    return %c0_i32, %c0_i32_0 : i32, i32
  }
  func.func @transform_7(%arg0: i32) -> (i32, i32) {
    %c0_i32 = arith.constant 0 : i32
    %c0_i32_0 = arith.constant 0 : i32
    %c0_i32_1 = arith.constant 0 : i32
    return %c0_i32, %c0_i32_0 : i32, i32
  }
  func.func @transform_8(%arg0: i32) -> (i32, i32) {
    %c0_i32 = arith.constant 0 : i32
    %c0_i32_0 = arith.constant 0 : i32
    %c0_i32_1 = arith.constant 0 : i32
    return %c0_i32, %c0_i32_0 : i32, i32
  }
  func.func @transform_9(%arg0: i32) -> (i32, i32) {
    %c0_i32 = arith.constant 0 : i32
    %c0_i32_0 = arith.constant 0 : i32
    %c0_i32_1 = arith.constant 0 : i32
    return %c0_i32, %c0_i32_0 : i32, i32
  }
  func.func @transform_10(%arg0: i32) -> (i32, i32) {
    %c0_i32 = arith.constant 0 : i32
    %c0_i32_0 = arith.constant 0 : i32
    return %arg0, %c0_i32 : i32, i32
  }
  func.func @transform_11(%arg0: i32) -> (i32, i32, i32, i32) {
    %c0_i32 = arith.constant 0 : i32
    %c0_i32_0 = arith.constant 0 : i32
    %c0_i32_1 = arith.constant 0 : i32
    %c0_i32_2 = arith.constant 0 : i32
    return %arg0, %c0_i32, %c0_i32_0, %c0_i32_1 : i32, i32, i32, i32
  }
}

</mosaic_0001>

<bundles_post_ra>
// kernel: _lambda_.1
= control target key start
LH: loop header
LB: loop body
LE: loop exit
PB: predicated region body
PF: predicated region fallthrough
CT: control target
= control target key end

     0   :  { %s2385_s0 = inlined_call_operand.hbm [shape: f32[16,32], index: 0, kind: input, shape index: {}]   ;;  %s2386_s1 = inlined_call_operand.vmem [shape: bf16[2,8,8], index: 1, kind: input, shape index: {}]   ;;  %s2387_s2 = inlined_call_operand.hbm [shape: bf16[32,96], index: 2, kind: input, shape index: {}]   ;;  %s2388_s3 = inlined_call_operand.hbm [shape: bf16[32,32], index: 3, kind: input, shape index: {}]   ;;  %s2389_s4 = inlined_call_operand.hbm [shape: bf16[32,64], index: 4, kind: input, shape index: {}]   ;;  %s2390_s5 = inlined_call_operand.vmem [shape: bf16[64,32], index: 5, kind: input, shape index: {}]   ;;  %s2391_s6 = inlined_call_operand.vmem [shape: f32[1,32], index: 6, kind: input, shape index: {}, may-alias: {6,8}]   ;;  %s2392_s7 = inlined_call_operand.vmem [shape: f32[1,32], index: 7, kind: input, shape index: {}, may-alias: {7,9}]   ;;  %s2393_s8 = inlined_call_operand.vmem [shape: f32[1,32], index: 8, kind: input, shape index: {}, may-alias: {6,8}]   ;;  %s2394_s9 = inlined_call_operand.vmem [shape: f32[1,32], index: 9, kind: input, shape index: {}, may-alias: {7,9}]   ;;  %s2395_s10 = inlined_call_operand.hbm [shape: f32[16,32], index: 10, kind: output, shape index: {0}]   ;;  %s2396_s11 = inlined_call_operand.hbm [shape: f32[2,4,8,8], index: 11, kind: output, shape index: {1}]  }
   0x1   :  { %2404 = sst [smem:[#allocation21_spill]] %s2387_s2 }
   0x2   :  { %2405 = sst [smem:[#allocation22_spill]] %s2388_s3 }
   0x3   :  { %2406 = sst [smem:[#allocation23_spill]] %s2389_s4 }
   0x4   :  { %17 = vsyncpa [#allocation3], 0 }
   0x5   :  { %19 = vsyncpa [#allocation3 + $0x1], 0 }
   0x6   :  { %20 = vsyncpa [#allocation6], 0 }
   0x7   :  { %21 = vsyncpa [#allocation9], 0 }
   0x8   :  { %22 = vsyncpa [#allocation4], 0 }
   0x9   :  { %24 = vsyncpa [#allocation4 + $0x1], 0 }
   0xa   :  { %25 = vsyncpa [#allocation12], 0 }
   0xb   :  { %27 = vsyncpa [#allocation12 + $0x1], 0  ;;  %s2023_s17 = smov 0   ;;  %s2025_s18 = smov 0  }
   0xc   :  { %s2027_s19 = smov 0   ;;  %s2029_s20 = smov 0  }
   0xd LB: > { %2407 = sst [smem:[#allocation18_spill]] %s1938_s19  ;;  %s2044_s21 = sadd.s32 4294967295, %s1942_s20   ;;  %s1942_s20 = sphi %s2029_s20, %s2429_s20   ;;  %s1938_s19 = sphi %s2027_s19, %s2431_s19   ;;  %s1934_s18 = sphi %s2025_s18, %s2433_s18   ;;  %s1930_s17 = sphi %s2023_s17, %s2432_s17  }
   0xe   : > { %s1445_s22 = sadd.s32 4294967294, %s1942_s20   ;;  %p53_p0 = scmp.ne.s32.totalorder %s1934_s18, %s1930_s17 }
   0xf   : > { %p2397_p1 = scmp.eq.s32.totalorder %s2044_s21, 0  ;;  %p277_p3 = scmp.eq.s32.totalorder %s1445_s22, 1 }
  0x10   : > { %p1446_p5 = scmp.ge.s32.totalorder %s1942_s20, 1  ;;  %p310_p7 = scmp.lt.s32.totalorder %s1942_s20, 3 }
  0x11   : > { %p2053_p4 = por %p2397_p1, %p53_p0  ;;  %p2058_p6 = por %p277_p3, %p53_p0 }
  0x12   : > { %p2063_p8 = pnand %p1446_p5, %p310_p7  ;;  %s1944_s26 = smov [#allocation5]  }
  0x13   : > { %s2408_s23 = scalar_select %p2053_p4, 1, 0 }
  0x14   : > { %s2409_s24 = scalar_select %p2058_p6, 1, 0 }
  0x15   : > { %s2410_s25 = scalar_select %p2063_p8, 1, 0 }
  0x16   : > { %s322_s27 = sshll.u32 %s1944_s26, 4  ;;  %p1627_p9 = pneg %p2063_p8  ;;  %s323_s27 = int_to_ptr.vmem [resolvable:$true] %s322_s27 }
  0x17   : > { %s1945_s29 = smov [#allocation7]   ;;  %s1946_s12 = smov [#allocation8]  }
  0x18   : > { %p2072_p11 = pnand %p1627_p9, %p2397_p1  ;;  %s335_s30 = sshll.u32 %s1945_s29, 4  ;;  %s336_s30 = int_to_ptr.vmem [resolvable:$true] %s335_s30 }
  0x19   : > { %s348_s13 = sshll.u32 %s1946_s12, 4  ;;  %s1745_s14 = scalar_lea.vmem %s323_s27, 256  ;;  %s349_s13 = int_to_ptr.vmem [resolvable:$true] %s348_s13 }
  0x1a   : > { %p1736_p12 = pneg %p2072_p11  ;;  %p1746_p13 = scmp.ne.s32.totalorder %s323_s27, %s1745_s14 }
  0x1b   : > { %p1753_p5 = scmp.lt.s32.totalorder %s323_s27, %s323_s27  ;;  %p1754_p7 = scmp.lt.s32.totalorder %s1745_s14, %s1745_s14 }
  0x1c   : > { %p1748_p0 = pnand %p1746_p13, %p1736_p12 }
  0x1d   : > { %p1755_p9 = por %p1754_p7, %p1753_p5 }
  0x1e   : > { %p1749_p3 = pneg %p1748_p0 }
  0x20   : > { %p1756_p10 = pnand %p1755_p9, %p1749_p3 }
  0x22   : > { %1759 = shalt.err (!%p1756_p10)
}
  0x23   : > { %s1947_s15 = smov 64   ;;  %s1948_s16 = smov 4  }
  0x24   : > { %s2412_s2 = sld [smem:[#allocation21_spill]]  ;;  %s1771_s29 = scalar_lea.vmem %s336_s30, 256 }
  0x25   : > { %p1772_p1 = scmp.ne.s32.totalorder %s336_s30, %s1771_s29  ;;  %p1779_p2 = scmp.lt.s32.totalorder %s336_s30, %s336_s30 }
  0x26   : > { %p1780_p6 = scmp.lt.s32.totalorder %s1771_s29, %s1771_s29 }
  0x27   : > { %p1774_p13 = pnand %p1772_p1, %p1736_p12 }
  0x28   : > { %p1781_p5 = por %p1780_p6, %p1779_p2 }
  0x29   : > { %p1775_p0 = pneg %p1774_p13 }
  0x2a   : > { %1630 = dma.hbm_to_vmem [thread:$0]  (!%p2072_p11), %s2412_s2, 256, %s323_s27, [#allocation6], %s1947_s15, %s1947_s15, %s1948_s16  }
  0x2b   : > { %p1782_p3 = pnand %p1781_p5, %p1775_p0 }
  0x2d   : > { %1785 = shalt.err (!%p1782_p3)
}
  0x2e   : > { %s2413_s3 = sld [smem:[#allocation22_spill]]  ;;  %s1797_s27 = scalar_lea.vmem %s349_s13, 256 }
  0x2f   : > { %p1798_p10 = scmp.ne.s32.totalorder %s349_s13, %s1797_s27  ;;  %p1805_p9 = scmp.lt.s32.totalorder %s349_s13, %s349_s13 }
  0x30   : > { %p1806_p13 = scmp.lt.s32.totalorder %s1797_s27, %s1797_s27 }
  0x31   : > { %p1800_p7 = pnand %p1798_p10, %p1736_p12 }
  0x32   : > { %p1807_p4 = por %p1806_p13, %p1805_p9 }
  0x33   : > { %p1801_p1 = pneg %p1800_p7 }
  0x34   : > { %1633 = dma.hbm_to_vmem [thread:$0]  (!%p2072_p11), %s2413_s3, 256, %s336_s30, [#allocation6], %s1947_s15, %s1947_s15, %s1948_s16  }
  0x35   : > { %p1808_p2 = pnand %p1807_p4, %p1801_p1 }
  0x37   : > { %1811 = shalt.err (!%p1808_p2)
}
  0x38   : > { %s2414_s4 = sld [smem:[#allocation23_spill]]  ;;  %s2103_s30 = sadd.s32 1, %s1942_s20  }
  0x39   : > { %2415 = sst [smem:[#allocation19_spill]] %s2103_s30  ;;  %s37_s29 = ssub.s32 %s1942_s20, %s2103_s30 }
  0x3a   : > { %s40_s28 = sadd.s32 1, %s1938_s19  ;;  %p38_p4 = scmp.eq.s32.totalorder %s37_s29, 0 }
  0x3b   : > { %p47_p6 = scmp.ne.s32.totalorder %s1938_s19, %s1934_s18  ;;  %p48_p12 = scmp.eq.s32.totalorder %s1942_s20, 0 }
  0x3c   : > { %p1651_p0 = scmp.lt.s32.totalorder %s1942_s20, 2  ;;  %p2417_p3 = scmp.eq.s32.totalorder %s2044_s21, 1 }
  0x3d   : > { %s2113_s12 = scalar_select %p38_p4, %s1938_s19, %s40_s28  }
  0x3e   : > { %1636 = dma.hbm_to_vmem [thread:$0]  (!%p2072_p11), %s2414_s4, 256, %s349_s13, [#allocation9], %s1947_s15, %s1947_s15, %s1948_s16  }
  0x3f   : > { %2416 = sst [smem:[#allocation20_spill]] %s2113_s12  ;;  %p49_p5 = por %p48_p12, %p47_p6 }
  0x40   : > { %p2117_p10 = por %p2417_p3, %p47_p6  ;;  %s377_s27 = sand.u32 1, %s1938_s19  }
  0x41   : > { %s1452_s22 = sshll.u32 %s1942_s20, 7  ;;  %s1451_s13 = sshll.u32 %s377_s27, 3 }
  0x42   : > { %s2418_s14 = scalar_select %p2117_p10, 1, 0 }
  0x43   : > { %s2126_s26 = scalar_lea.hbm %s2385_s0, %s1452_s22  ;;  %s381_s29 = scalar_lea.vmem [#allocation2], %s1451_s13 }
  0x44   : > { %s388_s28 = sshll.u32 %s381_s29, 4  ;;  %p2128_p11 = pnand %p1651_p0, %p49_p5  ;;  %s389_s28 = int_to_ptr.vmem [resolvable:$true] %s388_s28 }
  0x45   : > { %s378_s3 = scalar_lea.sflag [#allocation3], %s377_s27  ;;  %s1812_s4 = scalar_lea.hbm %s2126_s26, 128 }
  0x46   : > { %p1813_p7 = scmp.ne.s32.totalorder %s2126_s26, %s1812_s4  ;;  %p1814_p1 = pneg %p2128_p11 }
  0x47   : > { %s1817_s16 = scalar_lea.hbm %s2385_s0, 256  ;;  %p1818_p2 = scmp.lt.s32.totalorder %s2126_s26, %s2385_s0 }
  0x48   : > { %p1815_p9 = pnand %p1814_p1, %p1813_p7  ;;  %p1819_p4 = scmp.lt.s32.totalorder %s1817_s16, %s1812_s4 }
  0x4a   : > { %p1816_p13 = pneg %p1815_p9  ;;  %p1820_p6 = por %p1819_p4, %p1818_p2 }
  0x4c   : > { %p1821_p12 = pnand %p1820_p6, %p1816_p13 }
  0x4e   : > { %1824 = shalt.err (!%p1821_p12)
}
  0x4f   : > { %s1825_s29 = scalar_lea.vmem %s389_s28, 128  ;;  %s1949_s27 = smov [#allocation2]  }
  0x50   : > { %p1826_p0 = scmp.ne.s32.totalorder %s389_s28, %s1825_s29  ;;  %s1830_s19 = sshll.u32 %s1949_s27, 4  ;;  %s1831_s19 = int_to_ptr.vmem [resolvable:$false] %s1830_s19 }
  0x51   : > { %s1832_s30 = scalar_lea.vmem %s1831_s19, 256  ;;  %p1833_p7 = scmp.lt.s32.totalorder %s389_s28, %s1831_s19 }
  0x52   : > { %p1828_p5 = pnand %p1826_p0, %p1814_p1  ;;  %p1834_p9 = scmp.lt.s32.totalorder %s1832_s30, %s1825_s29 }
  0x54   : > { %p1829_p3 = pneg %p1828_p5  ;;  %p1835_p10 = por %p1834_p9, %p1833_p7 }
  0x56   : > { %p1836_p8 = pnand %p1835_p10, %p1829_p3 }
  0x58   : > { %1839 = shalt.err (!%p1836_p8)
}
  0x59   : > { %1640 = dma.hbm_to_vmem [thread:$0]  (!%p2128_p11), %s2126_s26, 128, %s389_s28, %s378_s3  }
  0x5a   : > { %p2420_p13 = scmp.ne.s32.totalorder %s2410_s25, 0 }
  0x5b   : > { %s2149_s4 = sand.u32 (!%p2420_p13), 1, %s1934_s18   ;;  %p2421_p10 = scmp.ne.s32.totalorder (!%p2420_p13), %s2408_s23, 0 }
  0x5c   : > { %404 = sbr.rel (%p2420_p13) target bundleno = 2593 (0xa21), region = 60  ;;  %s1454_s12 = sshll.u32 (!%p2420_p13), %s2149_s4, 3 }
  0x5d   : > { %s407_s19 = scalar_lea.sflag (!%p2420_p13), [#allocation3], %s2149_s4  ;;  %s410_s30 = scalar_lea.vmem (!%p2420_p13), [#allocation2], %s1454_s12 }
  0x61   : > { %1909 = dma.done.wait (%p2421_p10), %s407_s19, 128  }
  0x62   : > { %1911 = vsyncadd (%p2421_p10), %s407_s19, 4294967168  ;;  %p2422_p8 = scmp.eq.s32.totalorder %s2044_s21, 0 }
  0x64   : > { %1913 = dma.done.wait (%p2422_p8), [#allocation6], 512   ;;  %p2423_p11 = pmov %p2422_p8 }
  0x65   : > { %p2424_p1 = pmov %p2422_p8 }
  0x66   : > { %1915 = vsyncadd (%p2423_p11), [#allocation6], 4294966784 }
  0x67   : > { %1917 = dma.done.wait (%p2424_p1), [#allocation9], 256   ;;  %p2425_p2 = pmov %p2424_p1 }
  0x68   : > { %v1950_v0 = vmov 0.0   ;;  %vm1951_vm0 = vmmov 0   ;;  %v1704_v1 = vld [vmem:[#allocation5 + $0x8] sm:$0xff]   ;;  %v1705_v2 = vld [vmem:[#allocation5] sm:$0xff]   ;;  %v2173_v3 = vld [vmem:[%s410_s30] sm:$0xff]  ;;  %vm493_vm1 = vcmask 261120  }
  0x69   : > { %1919 = vsyncadd (%p2425_p2), [#allocation9], 4294967040  ;;  %1525 = vmatprep.subr.bf16.mxu0 %v1950_v0  ;;  %1529 = vmatprep.mubr.msk.bf16.mxu0 %vm1951_vm0, %v1950_v0  ;;  %v476_v4 = vpack.c.bf16 %v2173_v3, %v2173_v3  ;;  %s1952_s2 = smov 104   ;;  %s1953_s3 = smov 120   ;;  %vm547_vm2 = vcmask 64512   ;;  %vm801_vm3 = vcmask 1043456  }
  0x6a   : > { %1533 = vmatprep.subr.bf16.mxu1 %v1950_v0  ;;  %1535 = vmatprep.mubr.msk.bf16.mxu1 %vm1951_vm0, %v1950_v0  ;;  %s1954_s23 = smov 96   ;;  %s1955_s25 = smov 112   ;;  %vm1005_vm4 = vcmask 130048   ;;  %vm1008_vm5 = vcmask 195584   ;;  %vm1193_vm6 = vcmask 523264  }
  0x6b   : > { %1526 = vmatpush3.bf16.msra.mxu0 %v1704_v1  ;;  %p470_p4 = scmp.lt.s32.totalorder %s2044_s21, 1  ;;  %s1956_s13 = smov 64  }
  0x6c   : > { %1527 = vmatprep.subr.bf16.mxu0 %v1950_v0  ;;  %s1459_s29 = sshll.u32 %s2149_s4, 5  ;;  %s1957_s19 = smov 8  }
  0x6d   : > { %s471_s26 = scalar_select %p470_p4, %s2044_s21, 1 }
  0x6e   : > { %s2247_s27 = scalar_lea.vmem [#allocation11], %s1459_s29  ;;  %s1958_s30 = smov 16  }
  0x6f   : > { %1528 = vmatpush3.bf16.msra.mxu0 %v1705_v2  ;;  %s1460_s28 = sshll.u32 %s471_s26, 2  ;;  %s1273_s22 = scalar_lea.sflag [#allocation12], %s2149_s4 }
  0x70   : > { %1539 = vmatprep.subr.bf16.mxu0 %v1950_v0  ;;  %s473_s16 = scalar_lea.vmem %s2386_s1, %s1460_s28  ;;  %p2426_p12 = scmp.ne.s32.totalorder %s2418_s14, 0 }
  0x71   : > { %v738_v21 = vld [vmem:[%s473_s16] sm:$0xf]  ;;  %s1960_s16 = smov [#allocation11]  }
  0x72   : > { %1530 = vmatmul.mubr.msk.bf16.vlgmr.msra.gmra.mxu0 %vm493_vm1, %v476_v4  ;;  %v739_v22 = vunpack.c.l.bf16 %v738_v21 }
  0x73   : > { %1541 = vmatprep.mubr.msk.bf16.mxu0 %vm1951_vm0, %v1950_v0 }
 0x132   : > { %v531_v5 = vpop.f32.mrf.mxu0 }
 0x133   : > { %v2182_v6 = vpack.c.bf16 %v531_v5, %v531_v5 }
 0x134   : > { %v1531_v7 = vpop.f32.mrf.mxu0 }
 0x135   : > { %543 = vrot.lane.b32.xlu1 %v2182_v6, %s1952_s2  ;;  %539 = vrot.lane.b32.xlu0 %v2182_v6, %s1953_s3  ;;  %s1959_s2 = smov 24   ;;  %s1494_s3 = sshll.u32 %s2044_s21, 9 }
 0x136   : > { %v534_v8 = vpop.f32.mrf.mxu0  ;;  %s2313_s28 = scalar_lea.hbm %s2396_s11, %s1494_s3 }
 0x138   : > { %v1532_v9 = vpop.f32.mrf.mxu0 }
 0x139   : > { %545 = vrot.lane.b32.xlu1 %v2182_v6, %s1954_s23  ;;  %541 = vrot.lane.b32.xlu0 %v2182_v6, %s1955_s25 }
 0x1a7   : > { %v2188_v10 = vpop.permute.xlu1 %543  ;;  %v2190_v11 = vpop.permute.xlu0 %539 }
 0x1a8   : > { %594 = vrot.lane.b32.xlu0 %v2190_v11, %s1954_s23 }
 0x1ab   : > { %v546_v12 = vpop.permute.xlu1 %545  ;;  %v2193_v13 = vpop.permute.xlu0 %541 }
 0x1ac   : > { %690 = vrot.lane.b32.xlu0 %v2188_v10, %s1954_s23  ;;  %642 = vrot.lane.b32.xlu1 %v2193_v13, %s1954_s23  ;;  %v552_v14 = vsel %vm547_vm2, %v546_v12, 0  ;;  %s1299_s23 = sshll.u32 %s2247_s27, 4  ;;  %s2315_s23 = int_to_ptr.vmem [resolvable:$true] %s1299_s23 }
 0x1ad   : > { %1534 = vmatpush3.bf16.xpose.msra.mxu1 %v552_v14  ;;  %s1840_s15 = scalar_lea.vmem %s2315_s23, 512 }
 0x1ae   : > { %1545 = vmatprep.subr.bf16.mxu1 %v1950_v0  ;;  %p1841_p6 = scmp.ne.s32.totalorder %s2315_s23, %s1840_s15 }
 0x1b0   : > { %p1842_p0 = pnand %p1841_p6, %p2426_p12 }
 0x1b2   : > { %p1843_p5 = pneg %p1842_p0 }
 0x1b4   : > { %1536 = vmatmul.mubr.msk.bf16.vlgmr.msra.gmra.mxu1 %vm547_vm2, %v2182_v6 }
 0x1b5   : > { %1547 = vmatprep.mubr.msk.bf16.mxu1 %vm1951_vm0, %v1950_v0 }
 0x21a   : > { %v595_v15 = vpop.permute.xlu0 %594 }
 0x21b   : > { %v600_v16 = vsel %vm547_vm2, %v595_v15, 0 }
 0x21c   : > { %1540 = vmatpush3.bf16.xpose.msra.mxu0 %v600_v16 }
 0x21d   : > { %1551 = vmatprep.subr.bf16.mxu0 %v1950_v0 }
 0x21e   : > { %v643_v17 = vpop.permute.xlu1 %642  ;;  %v691_v19 = vpop.permute.xlu0 %690 }
 0x21f   : > { %v648_v18 = vsel %vm547_vm2, %v643_v17, 0  ;;  %v696_v20 = vsel %vm547_vm2, %v691_v19, 0 }
 0x220   : > { %1546 = vmatpush3.bf16.xpose.msra.mxu1 %v648_v18 }
 0x221   : > { %1557 = vmatprep.subr.bf16.mxu1 %v1950_v0 }
 0x223   : > { %1542 = vmatmul.mubr.msk.bf16.vlgmr.msra.gmra.mxu0 %vm547_vm2, %v2190_v11 }
 0x224   : > { %1552 = vmatpush3.bf16.xpose.msra.mxu0 %v696_v20  ;;  %1553 = vmatprep.mubr.msk.bf16.mxu0 %vm1951_vm0, %v1950_v0 }
 0x225   : > { %1563 = vmatprep.subr.bf16.mxu0 %v1950_v0 }
 0x227   : > { %1548 = vmatmul.mubr.msk.bf16.vlgmr.msra.gmra.mxu1 %vm547_vm2, %v2193_v13 }
 0x228   : > { %1559 = vmatprep.mubr.msk.bf16.mxu1 %vm1951_vm0, %v1950_v0 }
 0x22b   : > { %1554 = vmatmul.mubr.msk.bf16.vlgmr.msra.gmra.mxu0 %vm547_vm2, %v2188_v10 }
 0x22c   : > { %1565 = vmatprep.mubr.msk.bf16.mxu0 %vm1951_vm0, %v1950_v0 }
 0x274   : > { %v588_v23 = vpop.f32.mrf.mxu1 }
 0x275   : > { %v740_v24 = vadd.f32 %v739_v22, %v588_v23 }
 0x276   : > { %v1537_v25 = vpop.f32.mrf.mxu1 }
 0x277   : > { %v744_v26 = vsel %vm547_vm2, %v740_v24, -inf }
 0x278   : > { %v591_v27 = vpop.f32.mrf.mxu1  ;;  %745 = vmax.xlane.f32.xlu1 %v744_v26 }
 0x27a   : > { %v1538_v28 = vpop.f32.mrf.mxu1 }
 0x2e3   : > { %v636_v29 = vpop.f32.mrf.mxu0 }
 0x2e4   : > { %v741_v30 = vadd.f32 %v739_v22, %v636_v29 }
 0x2e5   : > { %v1543_v31 = vpop.f32.mrf.mxu0 }
 0x2e6   : > { %v747_v32 = vsel %vm547_vm2, %v741_v30, -inf }
 0x2e7   : > { %v684_v33 = vpop.f32.mrf.mxu1  ;;  %748 = vmax.xlane.f32.xlu0 %v747_v32  ;;  %v639_v34 = vpop.f32.mrf.mxu0 }
 0x2e8   : > { %v742_v35 = vadd.f32 %v739_v22, %v684_v33  ;;  %v1706_v33 = vld [vmem:[#allocation7 + $0x8] sm:$0xff]   ;;  %v1707_v34 = vld [vmem:[#allocation7] sm:$0xff]  }
 0x2e9   : > { %v1544_v36 = vpop.f32.mrf.mxu0  ;;  %v1549_v37 = vpop.f32.mrf.mxu1 }
 0x2ea   : > { %v750_v38 = vsel %vm547_vm2, %v742_v35, -inf }
 0x2eb   : > { %v687_v39 = vpop.f32.mrf.mxu1  ;;  %751 = vmax.xlane.f32.xlu0 %v750_v38  ;;  %v732_v40 = vpop.f32.mrf.mxu0 }
 0x2ec   : > { %v743_v41 = vadd.f32 %v739_v22, %v732_v40 }
 0x2ed   : > { %v1550_v42 = vpop.f32.mrf.mxu1  ;;  %v1555_v43 = vpop.f32.mrf.mxu0 }
 0x2ee   : > { %v753_v44 = vsel %vm547_vm2, %v743_v41, -inf }
 0x2ef   : > { %754 = vmax.xlane.f32.xlu1 %v753_v44  ;;  %v735_v45 = vpop.f32.mrf.mxu0 }
 0x2f1   : > { %v1556_v46 = vpop.f32.mrf.mxu0 }
 0x300   : > { %845 = vrot.lane.b32.xlu1 %v2190_v11, %s1956_s13 }
 0x301   : > { %796 = vrot.lane.b32.xlu0 %v2182_v6, %s1956_s13  ;;  %v746_v47 = vpop.xlane.xlu1 %745 }
 0x302   : > { %v756_v48 = vsub.f32 %v740_v24, %v746_v47 }
 0x304   : > { %v760_v49 = vmul.f32 1.442695, %v756_v48 }
 0x306   : > { %1714 = vpow2.f32 %v760_v49 }
 0x313   : > { %v1715_v50 = vpop.eup %1714 }
 0x314   : > { %v768_v51 = vsel %vm547_vm2, %v1715_v50, 0.0 }
 0x320   : > { %769 = vadd.xlane.f32.xlu0 %v768_v51 }
 0x370   : > { %v749_v52 = vpop.xlane.xlu0 %748 }
 0x371   : > { %v757_v53 = vsub.f32 %v741_v30, %v749_v52 }
 0x373   : > { %v762_v54 = vmul.f32 1.442695, %v757_v53 }
 0x374   : > { %v752_v55 = vpop.xlane.xlu0 %751 }
 0x375   : > { %1716 = vpow2.f32 %v762_v54  ;;  %v758_v56 = vsub.f32 %v742_v35, %v752_v55 }
 0x377   : > { %v764_v57 = vmul.f32 1.442695, %v758_v56 }
 0x378   : > { %v797_v58 = vpop.permute.xlu0 %796  ;;  %v755_v59 = vpop.xlane.xlu1 %754 }
 0x379   : > { %1718 = vpow2.f32 %v764_v57  ;;  %v803_v60 = vsel %vm801_vm3, %v797_v58, 0  ;;  %v759_v61 = vsub.f32 %v743_v41, %v755_v59 }
 0x37a   : > { %1558 = vmatpush3.bf16.msra.mxu1 %v803_v60 }
 0x37b   : > { %v766_v62 = vmul.f32 1.442695, %v759_v61  ;;  %1569 = vmatprep.subr.bf16.mxu1 %v1950_v0 }
 0x37c   : > { %v846_v63 = vpop.permute.xlu1 %845 }
 0x37d   : > { %1720 = vpow2.f32 %v766_v62  ;;  %v851_v1 = vsel %vm801_vm3, %v846_v63, 0 }
 0x37e   : > { %1564 = vmatpush3.bf16.msra.mxu0 %v851_v1 }
 0x37f   : > { %1575 = vmatprep.subr.bf16.mxu0 %v1950_v0 }
 0x382   : > { %v1717_v2 = vpop.eup %1716 }
 0x383   : > { %v771_v4 = vsel %vm547_vm2, %v1717_v2, 0.0 }
 0x384   : > { %772 = vadd.xlane.f32.xlu1 %v771_v4 }
 0x386   : > { %v1719_v5 = vpop.eup %1718 }
 0x387   : > { %v774_v6 = vsel %vm547_vm2, %v1719_v5, 0.0 }
 0x388   : > { %775 = vadd.xlane.f32.xlu0 %v774_v6  ;;  %v1708_v6 = vld [vmem:[#allocation8 + $0x8] sm:$0xff]  }
 0x38a   : > { %v1721_v7 = vpop.eup %1720 }
 0x38b   : > { %v777_v8 = vsel %vm547_vm2, %v1721_v7, 0.0 }
 0x38c   : > { %778 = vadd.xlane.f32.xlu1 %v777_v8  ;;  %v1711_v8 = vld [vmem:[%s2390_s5 + $0x10] sm:$0xff]  }
 0x39d   : > { %893 = vrot.lane.b32.xlu1 %v2193_v13, %s1956_s13 }
 0x39e   : > { %941 = vrot.lane.b32.xlu0 %v2188_v10, %s1956_s13  ;;  %s1844_s13 = sshll.u32 %s1960_s16, 4  ;;  %s1845_s13 = int_to_ptr.vmem [resolvable:$false] %s1844_s13 }
 0x39f   : > { %p1847_p3 = scmp.lt.s32.totalorder %s2315_s23, %s1845_s13 }
 0x3a9   : > { %v770_v9 = vpop.xlane.xlu0 %769 }
 0x3aa   : > { %1722 = vrcp.f32 %v770_v9  ;;  %v1712_v9 = vld [vmem:[%s2390_s5 + $0x8] sm:$0xff]  }
 0x3b7   : > { %v1723_v11 = vpop.eup %1722 }
 0x3b8   : > { %v784_v12 = vmul.f32 %v1723_v11, %v1715_v50 }
 0x3ba   : > { %788 = vst.msk [vmem:[%s2247_s27] sm:$0xff] %vm547_vm2, %v784_v12  ;;  %v792_v14 = vpack.c.bf16 %v784_v12, %v784_v12 }
 0x3bc   : > { %1560 = vmatmul.mubr.msk.bf16.vlgmr.msra.gmra.mxu1 %vm547_vm2, %v792_v14 }
 0x3bd   : > { %1571 = vmatprep.mubr.msk.bf16.mxu1 %vm1951_vm0, %v1950_v0 }
 0x40d   : > { %v773_v13 = vpop.xlane.xlu1 %772 }
 0x40e   : > { %1724 = vrcp.f32 %v773_v13 }
 0x411   : > { %v776_v10 = vpop.xlane.xlu0 %775 }
 0x412   : > { %1726 = vrcp.f32 %v776_v10  ;;  %v1475_v10 = vld [vmem:[%s2391_s6] ss:$0 sm:$0xff] }
 0x415   : > { %v779_v15 = vpop.xlane.xlu1 %778  ;;  %v942_v20 = vpop.permute.xlu0 %941 }
 0x416   : > { %1728 = vrcp.f32 %v779_v15  ;;  %v947_v23 = vsel %vm801_vm3, %v942_v20, 0 }
 0x419   : > { %v894_v16 = vpop.permute.xlu1 %893 }
 0x41a   : > { %v899_v17 = vsel %vm801_vm3, %v894_v16, 0  ;;  %v1476_v16 = vld [vmem:[%s2392_s7] ss:$0 sm:$0xff] }
 0x41b   : > { %v1725_v18 = vpop.eup %1724  ;;  %1570 = vmatpush3.bf16.msra.mxu1 %v899_v17 }
 0x41c   : > { %v785_v19 = vmul.f32 %v1725_v18, %v1717_v2  ;;  %1581 = vmatprep.subr.bf16.mxu1 %v1950_v0 }
 0x41e   : > { %789 = vst.msk [vmem:[%s2247_s27 + $0x8] sm:$0xff] %vm547_vm2, %v785_v19  ;;  %v793_v21 = vpack.c.bf16 %v785_v19, %v785_v19 }
 0x41f   : > { %v1727_v22 = vpop.eup %1726 }
 0x420   : > { %1566 = vmatmul.mubr.msk.bf16.vlgmr.msra.gmra.mxu0 %vm547_vm2, %v793_v21  ;;  %v786_v24 = vmul.f32 %v1727_v22, %v1719_v5 }
 0x421   : > { %1576 = vmatpush3.bf16.msra.mxu0 %v947_v23  ;;  %1577 = vmatprep.mubr.msk.bf16.mxu0 %vm1951_vm0, %v1950_v0 }
 0x422   : > { %790 = vst.msk [vmem:[%s2247_s27 + $0x10] sm:$0xff] %vm547_vm2, %v786_v24  ;;  %v794_v25 = vpack.c.bf16 %v786_v24, %v786_v24  ;;  %1589 = vmatprep.subr.bf16.mxu0 %v1950_v0 }
 0x423   : > { %v1729_v26 = vpop.eup %1728 }
 0x424   : > { %1572 = vmatmul.mubr.msk.bf16.vlgmr.msra.gmra.mxu1 %vm547_vm2, %v794_v25  ;;  %v787_v27 = vmul.f32 %v1729_v26, %v1721_v7  ;;  %v1709_v7 = vld [vmem:[#allocation8] sm:$0xff]  }
 0x425   : > { %1585 = vmatprep.mubr.msk.bf16.mxu1 %vm1951_vm0, %v1950_v0  ;;  %1582 = vmatpush3.bf16.msra.mxu1 %v1706_v33 }
 0x426   : > { %791 = vst.msk [vmem:[%s2247_s27 + $0x18] sm:$0xff] %vm547_vm2, %v787_v27  ;;  %v795_v28 = vpack.c.bf16 %v787_v27, %v787_v27  ;;  %1583 = vmatprep.subr.bf16.mxu1 %v1950_v0  ;;  %s1846_s27 = scalar_lea.vmem %s1845_s13, 1024 }
 0x427   : > { %p1848_p7 = scmp.lt.s32.totalorder %s1846_s27, %s1840_s15 }
 0x428   : > { %1578 = vmatmul.mubr.msk.bf16.vlgmr.msra.gmra.mxu0 %vm547_vm2, %v795_v28 }
 0x429   : > { %1593 = vmatprep.mubr.msk.bf16.mxu0 %vm1951_vm0, %v1950_v0  ;;  %1584 = vmatpush3.bf16.msra.mxu1 %v1707_v34  ;;  %p1849_p9 = por %p1848_p7, %p1847_p3 }
 0x42a   : > { %1597 = vmatprep.subr.bf16.mxu1 %v1950_v0  ;;  %1590 = vmatpush3.bf16.msra.mxu0 %v1708_v6 }
 0x42b   : > { %1591 = vmatprep.subr.bf16.mxu0 %v1950_v0  ;;  %p1850_p13 = pnand %p1849_p9, %p1843_p5 }
 0x42e   : > { %1592 = vmatpush3.bf16.msra.mxu0 %v1709_v7 }
 0x47c   : > { %v839_v29 = vpop.f32.mrf.mxu1 }
 0x47d   : > { %v989_v51 = vpack.c.bf16 %v839_v29, %v839_v29 }
 0x47e   : > { %v1561_v30 = vpop.f32.mrf.mxu1 }
 0x480   : > { %v842_v31 = vpop.f32.mrf.mxu1 }
 0x482   : > { %v1562_v32 = vpop.f32.mrf.mxu1 }
 0x4e0   : > { %v887_v35 = vpop.f32.mrf.mxu0 }
 0x4e1   : > { %v990_v36 = vpack.c.bf16 %v887_v35, %v887_v35 }
 0x4e2   : > { %v1567_v37 = vpop.f32.mrf.mxu0 }
 0x4e3   : > { %994 = vrot.lane.b32.xlu1 %v990_v36, %s1957_s19 }
 0x4e4   : > { %v890_v38 = vpop.f32.mrf.mxu0  ;;  %v935_v39 = vpop.f32.mrf.mxu1 }
 0x4e5   : > { %v991_v40 = vpack.c.bf16 %v935_v39, %v935_v39 }
 0x4e6   : > { %v1568_v41 = vpop.f32.mrf.mxu0  ;;  %v1573_v42 = vpop.f32.mrf.mxu1 }
 0x4e7   : > { %997 = vrot.lane.b32.xlu0 %v991_v40, %s1958_s30 }
 0x4e8   : > { %v938_v43 = vpop.f32.mrf.mxu1  ;;  %v983_v44 = vpop.f32.mrf.mxu0 }
 0x4e9   : > { %v992_v45 = vpack.c.bf16 %v983_v44, %v983_v44 }
 0x4ea   : > { %v1574_v46 = vpop.f32.mrf.mxu1  ;;  %v1579_v47 = vpop.f32.mrf.mxu0 }
 0x4eb   : > { %1000 = vrot.lane.b32.xlu1 %v992_v45, %s1959_s2 }
 0x4ec   : > { %v986_v48 = vpop.f32.mrf.mxu0 }
 0x4ee   : > { %v1580_v49 = vpop.f32.mrf.mxu0 }
 0x555   : > { %v995_v50 = vpop.permute.xlu1 %994 }
 0x556   : > { %v1004_v53 = vsel %vm547_vm2, %v989_v51, %v995_v50 }
 0x559   : > { %v998_v52 = vpop.permute.xlu0 %997 }
 0x55a   : > { %v1007_v54 = vsel %vm1005_vm4, %v1004_v53, %v998_v52 }
 0x55d   : > { %v1001_v55 = vpop.permute.xlu1 %1000 }
 0x55e   : > { %v1010_v56 = vsel %vm1008_vm5, %v1007_v54, %v1001_v55 }
 0x55f   : > { %1586 = vmatmul.mubr.msk.bf16.vlgmr.msra.gmra.mxu1 %vm493_vm1, %v1010_v56 }
 0x560   : > { %1605 = vmatprep.mubr.msk.bf16.mxu1 %vm1951_vm0, %v1950_v0 }
 0x61f   : > { %v1063_v57 = vpop.f32.mrf.mxu1 }
 0x620   : > { %v1064_v58 = vadd.f32 %v1063_v57, %v2173_v3  ;;  %v1710_v3 = vld [vmem:[%s2390_s5 + $0x18] sm:$0xff]  }
 0x621   : > { %v1587_v59 = vpop.f32.mrf.mxu1  ;;  %1598 = vmatpush3.bf16.msra.mxu1 %v1710_v3 }
 0x622   : > { %v1069_v60 = vsel %vm493_vm1, %v1064_v58, 0.0  ;;  %1599 = vmatprep.subr.bf16.mxu1 %v1950_v0 }
 0x623   : > { %1070 = vadd.xlane.f32.xlu0 %v1069_v60  ;;  %v1066_v61 = vpop.f32.mrf.mxu1 }
 0x625   : > { %v1588_v62 = vpop.f32.mrf.mxu1  ;;  %1600 = vmatpush3.bf16.msra.mxu1 %v1711_v8 }
 0x626   : > { %1601 = vmatprep.subr.bf16.mxu1 %v1950_v0 }
 0x629   : > { %1602 = vmatpush3.bf16.msra.mxu1 %v1712_v9 }
 0x62a   : > { %1603 = vmatprep.subr.bf16.mxu1 %v1950_v0  ;;  %v1713_v0 = vld [vmem:[%s2390_s5] sm:$0xff]  }
 0x62d   : > { %1604 = vmatpush3.bf16.msra.mxu1 %v1713_v0 }
 0x6ac   : > { %v1071_v63 = vpop.xlane.xlu0 %1070 }
 0x6ad   : > { %v1073_v1 = vmul.f32 0.03125, %v1071_v63 }
 0x6af   : > { %v1074_v2 = vsub.f32 %v1064_v58, %v1073_v1 }
 0x6b1   : > { %v1075_v4 = vmul.f32 %v1074_v2, %v1074_v2 }
 0x6b3   : > { %v1076_v5 = vsel %vm493_vm1, %v1075_v4, 0.0 }
 0x6b4   : > { %1077 = vadd.xlane.f32.xlu1 %v1076_v5 }
 0x73d   : > { %v1078_v11 = vpop.xlane.xlu1 %1077 }
 0x73e   : > { %v1079_v12 = vmul.f32 0.03125, %v1078_v11 }
 0x740   : > { %v1080_v14 = vadd.f32 1e-05, %v1079_v12 }
 0x742   : > { %1730 = vrsqrt.f32 %v1080_v14 }
 0x74f   : > { %v1731_v13 = vpop.eup %1730 }
 0x750   : > { %v1082_v15 = vmul.f32 %v1731_v13, %v1074_v2 }
 0x752   : > { %v1090_v17 = vmul.f32 %v1475_v10, %v1082_v15 }
 0x754   : > { %v1098_v18 = vadd.f32 %v1476_v16, %v1090_v17 }
 0x756   : > { %v1099_v19 = vpack.c.bf16 %v1098_v18, %v1098_v18 }
 0x758   : > { %1594 = vmatmul.mubr.msk.bf16.vlgmr.msra.gmra.mxu0 %vm493_vm1, %v1099_v19 }
 0x818   : > { %v1153_v20 = vpop.f32.mrf.mxu0 }
 0x819   : > { %v1159_v21 = vmax.f32 %v1153_v20, 0.0 }
 0x81a   : > { %v1595_v22 = vpop.f32.mrf.mxu0 }
 0x81b   : > { %v1160_v23 = vpack.c.bf16 %v1159_v21, %v1159_v21 }
 0x81c   : > { %v1156_v24 = vpop.f32.mrf.mxu0 }
 0x81d   : > { %1606 = vmatmul.mubr.msk.bf16.vlgmr.msra.gmra.mxu1 %vm1193_vm6, %v1160_v23 }
 0x81e   : > { %v1596_v25 = vpop.f32.mrf.mxu0 }
 0x8dd   : > { %v1231_v26 = vpop.f32.mrf.mxu1 }
 0x8de   : > { %v1232_v27 = vadd.f32 %v1231_v26, %v1098_v18 }
 0x8df   : > { %v1607_v28 = vpop.f32.mrf.mxu1 }
 0x8e0   : > { %v1237_v29 = vsel %vm493_vm1, %v1232_v27, 0.0 }
 0x8e1   : > { %1238 = vadd.xlane.f32.xlu0 %v1237_v29  ;;  %v1234_v30 = vpop.f32.mrf.mxu1 }
 0x8e3   : > { %v1608_v31 = vpop.f32.mrf.mxu1 }
 0x96a   : > { %v1239_v32 = vpop.xlane.xlu0 %1238 }
 0x96b   : > { %v1240_v33 = vmul.f32 0.03125, %v1239_v32 }
 0x96d   : > { %v1241_v34 = vsub.f32 %v1232_v27, %v1240_v33 }
 0x96f   : > { %v1242_v35 = vmul.f32 %v1241_v34, %v1241_v34 }
 0x971   : > { %v1243_v36 = vsel %vm493_vm1, %v1242_v35, 0.0 }
 0x972   : > { %1244 = vadd.xlane.f32.xlu0 %v1243_v36 }
 0x973   : > { %1853 = shalt.err (!%p1850_p13)
}
 0x974   : > { %s1854_s29 = scalar_lea.hbm %s2313_s28, 512  ;;  %s1858_s3 = scalar_lea.hbm %s2396_s11, 1024 }
 0x975   : > { %p1855_p10 = scmp.ne.s32.totalorder %s2313_s28, %s1854_s29  ;;  %p1859_p1 = scmp.lt.s32.totalorder %s2313_s28, %s2396_s11 }
 0x976   : > { %p1860_p2 = scmp.lt.s32.totalorder %s1858_s3, %s1854_s29 }
 0x977   : > { %p1856_p8 = pnand %p1855_p10, %p2426_p12 }
 0x978   : > { %p1861_p4 = por %p1860_p2, %p1859_p1 }
 0x979   : > { %p1857_p11 = pneg %p1856_p8 }
 0x97b   : > { %p1862_p6 = pnand %p1861_p4, %p1857_p11 }
 0x97d   : > { %1865 = shalt.err (!%p1862_p6)
}
 0x97e   : > { %s1961_s15 = smov 128   ;;  %v1485_v41 = vld [vmem:[%s2393_s8] ss:$0 sm:$0xff]  ;;  %s1489_s30 = sshll.u32 %s2044_s21, 7 }
 0x97f   : > { %1624 = dma.vmem_to_hbm [thread:$0]  (%p2426_p12), %s2315_s23, 512, %s2313_s28, %s1273_s22, %s1961_s15, %s1961_s15, %s1957_s19  }
 0x980   : > { %v1486_v43 = vld [vmem:[%s2394_s9] ss:$0 sm:$0xff]  ;;  %s462_s2 = scalar_lea.vmem [#allocation10], %s1454_s12  ;;  %s1284_s22 = scalar_lea.hbm %s2395_s10, %s1489_s30 }
 0x981   : > { %s1286_s19 = sshll.u32 %s462_s2, 4  ;;  %s1268_s3 = scalar_lea.sflag [#allocation4], %s2149_s4  ;;  %s1287_s19 = int_to_ptr.vmem [resolvable:$true] %s1286_s19 }
 0x982   : > { %s1866_s25 = scalar_lea.vmem %s1287_s19, 128  ;;  %s1962_s26 = smov [#allocation10]  }
 0x983   : > { %p1867_p0 = scmp.ne.s32.totalorder %s1287_s19, %s1866_s25  ;;  %s1870_s21 = sshll.u32 %s1962_s26, 4  ;;  %s1871_s21 = int_to_ptr.vmem [resolvable:$false] %s1870_s21 }
 0x984   : > { %s1872_s12 = scalar_lea.vmem %s1871_s21, 256  ;;  %p1873_p7 = scmp.lt.s32.totalorder %s1287_s19, %s1871_s21 }
 0x985   : > { %p1868_p5 = pnand %p1867_p0, %p2426_p12  ;;  %p1874_p9 = scmp.lt.s32.totalorder %s1872_s12, %s1866_s25 }
 0x987   : > { %p1869_p3 = pneg %p1868_p5  ;;  %p1875_p13 = por %p1874_p9, %p1873_p7 }
 0x989   : > { %p1876_p10 = pnand %p1875_p13, %p1869_p3 }
 0x9fb   : > { %v1245_v37 = vpop.xlane.xlu0 %1244 }
 0x9fc   : > { %v1246_v38 = vmul.f32 0.03125, %v1245_v37 }
 0x9fe   : > { %v1247_v39 = vadd.f32 1e-05, %v1246_v38 }
 0xa00   : > { %1732 = vrsqrt.f32 %v1247_v39 }
 0xa0d   : > { %v1733_v40 = vpop.eup %1732 }
 0xa0e   : > { %v1249_v42 = vmul.f32 %v1733_v40, %v1241_v34 }
 0xa10   : > { %v1257_v44 = vmul.f32 %v1485_v41, %v1249_v42 }
 0xa12   : > { %v1265_v45 = vadd.f32 %v1486_v43, %v1257_v44 }
 0xa14   : > { %1266 = vst.msk [vmem:[%s462_s2] sm:$0xff] %vm493_vm1, %v1265_v45 }
 0xa15   : > { %1879 = shalt.err (!%p1876_p10)
}
 0xa16   : > { %s1880_s15 = scalar_lea.hbm %s1284_s22, 128  ;;  %s1884_s13 = scalar_lea.hbm %s2395_s10, 256 }
 0xa17   : > { %p1881_p8 = scmp.ne.s32.totalorder %s1284_s22, %s1880_s15  ;;  %p1885_p2 = scmp.lt.s32.totalorder %s1284_s22, %s2395_s10 }
 0xa18   : > { %p1886_p4 = scmp.lt.s32.totalorder %s1884_s13, %s1880_s15 }
 0xa19   : > { %p1882_p11 = pnand %p1881_p8, %p2426_p12 }
 0xa1a   : > { %p1887_p6 = por %p1886_p4, %p1885_p2 }
 0xa1b   : > { %p1883_p1 = pneg %p1882_p11 }
 0xa1d   : > { %p1888_p0 = pnand %p1887_p6, %p1883_p1 }
 0xa1f   : > { %1891 = shalt.err (!%p1888_p0)
}
 0xa20   : > { %1623 = dma.vmem_to_hbm [thread:$0]  (%p2426_p12), %s1287_s19, 128, %s1284_s22, %s1268_s3  }
 0xa21 PF: > { %s1314_s30 = sand.u32 1, %s1930_s17   ;;  %p2427_p5 = scmp.ne.s32.totalorder %s2409_s24, 0 }
 0xa22   : > { %p2428_p3 = scmp.ge.s32.totalorder %s1942_s20, 2  ;;  %s1315_s2 = scalar_lea.sflag [#allocation4], %s1314_s30 }
 0xa24   : > { %p1642_p7 = pnand %p2428_p3, %p2427_p5 }
 0xa26   : > { %p1643_p9 = pneg %p1642_p7 }
 0xa28   : > { %1921 = dma.done.wait (%p1643_p9), %s1315_s2, 128  }
 0xa29   : > { %1923 = vsyncadd (%p1643_p9), %s1315_s2, 4294967168  ;;  %s1324_s23 = scalar_lea.sflag [#allocation12], %s1314_s30 }
 0xa2a   : > { %1925 = dma.done.wait (%p1643_p9), %s1324_s23, 512  }
 0xa2b   : > { %1927 = vsyncadd (%p1643_p9), %s1324_s23, 4294966784  ;;  %s2429_s20 = sld [smem:[#allocation19_spill]]  ;;  %s2432_s17 = smov %s1934_s18 }
 0xa2c   : > { %s2430_s28 = sld [smem:[#allocation18_spill]] }
 0xa2d   : > { %s2431_s19 = sld [smem:[#allocation20_spill]] }
 0xa31   : > { %p30_p12 = scmp.ge.s32.totalorder %s2429_s20, 4  }
 0xa32   : > { %s2433_s18 = smov %s2430_s28 }
 0xa33   :  { %32 = sbr.rel (!%p30_p12) target bundleno = 13 (0xd), region = 137 }
 0xa38   :  { %1329 = vsyncpa [#allocation3], 1 }
 0xa39   :  { %1331 = vsyncpa [#allocation3 + $0x1], 1 }
 0xa3a   :  { %1332 = vsyncpa [#allocation6], 1 }
 0xa3b   :  { %1333 = vsyncpa [#allocation9], 1 }
 0xa3c   :  { %1334 = vsyncpa [#allocation4], 1 }
 0xa3d   :  { %1336 = vsyncpa [#allocation4 + $0x1], 1 }
 0xa3e   :  { %1337 = vsyncpa [#allocation12], 1 }
 0xa3f   :  { %1339 = vsyncpa [#allocation12 + $0x1], 1 }

</bundles_post_ra>
